<compile_context>
chip_gen: v7x
topology: tpu7x:2x2x1
jax: 0.10.0
libtpu: 0.0.40
codegen_flags: <defaults>
</compile_context>

<pallas_src>
import math

import jax
import jax.numpy as jnp
from jax.experimental import pallas as pl
from jax.experimental.pallas import tpu as pltpu


def _noise_add_kernel(hi_ref, wi_ref, sig_ref, x_ref, n_ref, o_ref):
    # hi_ref : (H, 1)  int32  nearest source-row index for every output row
    # wi_ref : (1, W)  int32  nearest source-col index for every output col
    # sig_ref: (Hs, Ws)       tiny per-channel sigma block (un-clamped)
    # x_ref / n_ref / o_ref: (b_tile, H, W)
    hi = hi_ref[...]                       # (H, 1)
    wi = wi_ref[...]                       # (1, W)
    n_h, n_w = sig_ref.shape               # (Hs, Ws) -- static python ints
    H = hi.shape[0]
    W = wi.shape[1]

    # ---- exact nearest-neighbor upsample of sigma to (H, W) -----------------
    # One-hot selection, unrolled over the (small) sigma grid: Hs + Ws cheap
    # VPU select/adds, fully hidden under the HBM-bound elementwise stream.
    # Step 1: expand columns  (Hs, Ws) -> (Hs, W)
    sig_cols = jnp.zeros((n_h, W), jnp.float32)
    for j in range(n_w):
        col = jnp.clip(sig_ref[:, j:j + 1].astype(jnp.float32), 0.001, 1.0)  # (Hs, 1)
        sig_cols = sig_cols + jnp.where(wi == j, col, 0.0)                    # (Hs, W)
    # Step 2: expand rows  (Hs, W) -> (H, W)
    scale = jnp.zeros((H, W), jnp.float32)
    for i in range(n_h):
        scale = scale + jnp.where(hi == i, sig_cols[i:i + 1, :], 0.0)         # (H, W)

    # ---- fused elementwise hot path (scale broadcasts over the batch tile) --
    x_f = x_ref[...].astype(jnp.float32)
    n_f = n_ref[...].astype(jnp.float32)
    o_ref[...] = (x_f + scale * n_f).astype(o_ref.dtype)


def _nearest_src_index(out_size, in_size):
    # PyTorch F.interpolate(mode='nearest'): src = floor(dst * in / out)
    return (jnp.arange(out_size, dtype=jnp.int32) * in_size) // out_size


def _pick_batch_tile(batch, h, w, itemsize, target_block_bytes=2 * 1024 * 1024):
    # Largest divisor of `batch` whose (b_tile, H, W) block stays under the
    # per-block budget (keeps 3 streams x 2 buffers well inside VMEM on all
    # generations, incl. v7x's 64 MiB).
    cap = max(1, target_block_bytes // (h * w * itemsize))
    best = 1
    for d in range(1, batch + 1):
        if batch % d == 0 and d <= cap:
            best = d
    return best


def noise_layer_forward(x, unit_noise, sigma, image_size):
    """x, unit_noise: (B, C, H, W); sigma: (1, C, Hs, Ws); image_size == (H, W)."""
    B, C, H, W = x.shape
    assert (H, W) == tuple(image_size)
    assert unit_noise.shape == x.shape
    assert sigma.shape[0] == 1 and sigma.shape[1] == C
    Hs, Ws = int(sigma.shape[2]), int(sigma.shape[3])

    hi = _nearest_src_index(H, Hs).reshape(H, 1)       # (H, 1) int32
    wi = _nearest_src_index(W, Ws).reshape(1, W)       # (1, W) int32

    b_tile = _pick_batch_tile(B, H, W, x.dtype.itemsize)
    grid = (C, B // b_tile)                            # C outermost -> sigma reused

    big_spec = pl.BlockSpec((b_tile, None, H, W), lambda c, bb: (bb, c, 0, 0))

    out = pl.pallas_call(
        _noise_add_kernel,
        out_shape=jax.ShapeDtypeStruct((B, C, H, W), x.dtype),
        grid=grid,
        in_specs=[
            pl.BlockSpec((H, 1), lambda c, bb: (0, 0)),                       # hi
            pl.BlockSpec((1, W), lambda c, bb: (0, 0)),                       # wi
            pl.BlockSpec((None, None, Hs, Ws), lambda c, bb: (0, c, 0, 0)),   # sigma
            big_spec,                                                         # x
            big_spec,                                                         # unit_noise
        ],
        out_specs=big_spec,
        compiler_params=pltpu.CompilerParams(
            dimension_semantics=("parallel", "parallel"),
            vmem_limit_bytes=32 * 1024 * 1024),
    )(hi, wi, sigma, x, unit_noise)

    # Penalty over ~C*Hs*Ws elements -> plain JAX (a standalone pallas_call
    # launch costs more than the reduction itself).
    sig_c = jnp.clip(sigma.astype(jnp.float32), 0.001, 1.0)
    penalty = (jnp.mean(jnp.log(sig_c))
               + 0.5 * jnp.log(jnp.float32(2.0 * math.pi))
               + jnp.float32(0.5))

    # TODO(synk): the in-place clamp of the torch Parameter (.data.clamp_) is a
    # training-side mutation; here the clamp is applied functionally.
    return out, penalty


if __name__ == "__main__":
    key = jax.random.PRNGKey(0)
    k_sig, k_x, k_n = jax.random.split(key, 3)

    B, C, H, W = 2, 4, 16, 16
    Hs, Ws = 4, 4
    image_size = (H, W)

    sigma = jax.random.uniform(k_sig, (1, C, Hs, Ws), jnp.float32,
                               minval=0.05, maxval=0.8)
    x = jax.random.normal(k_x, (B, C, H, W), jnp.float32)
    unit_noise = jax.random.normal(k_n, (B, C, H, W), jnp.float32)

    out, penalty = noise_layer_forward(x, unit_noise, sigma, image_size)
    out = jax.block_until_ready(out)
    penalty = jax.block_until_ready(penalty)

    # pure-JAX reference check
    sig_c = jnp.clip(sigma, 0.001, 1.0)
    hi = (jnp.arange(H) * Hs) // H
    wi = (jnp.arange(W) * Ws) // W
    sig_up = sig_c[0][:, hi, :][:, :, wi]              # (C, H, W)
    ref_out = x + sig_up[None] * unit_noise
    ref_pen = (jnp.mean(jnp.log(sig_c))
               + 0.5 * jnp.log(jnp.float32(2.0 * math.pi)) + 0.5)
    assert jnp.allclose(out, ref_out, atol=1e-6, rtol=1e-6)
    assert jnp.allclose(penalty, ref_pen, atol=1e-6, rtol=1e-6)

    print("KERNEL_OK")
</pallas_src>

<mosaic_0001>
module attributes {stable_mosaic.version = 11 : i64} {
  func.func @_noise_add_kernel(%arg0: i32, %arg1: i32, %arg2: memref<16x1xi32, #tpu.memory_space<vmem>>, %arg3: memref<1x16xi32, #tpu.memory_space<vmem>>, %arg4: memref<1x1x4x4xf32, #tpu.memory_space<vmem>>, %arg5: memref<2x1x16x16xf32, #tpu.memory_space<vmem>>, %arg6: memref<2x1x16x16xf32, #tpu.memory_space<vmem>>, %arg7: memref<2x1x16x16xf32, #tpu.memory_space<vmem>>) attributes {dimension_semantics = [#tpu.dimension_semantics<parallel>, #tpu.dimension_semantics<parallel>], iteration_bounds = array<i64: 4, 1>, scalar_prefetch = 0 : i64, scratch_operands = 0 : i64, tpu.core_type = #tpu.core_type<tc>, window_params = [{pipeline_mode = #tpu.pipeline_mode<synchronous>, transform_indices = @transform_0, window_bounds = array<i64: 16, 1>}, {pipeline_mode = #tpu.pipeline_mode<synchronous>, transform_indices = @transform_1, window_bounds = array<i64: 1, 16>}, {transform_indices = @transform_2, window_bounds = array<i64: 1, 1, 4, 4>}, {transform_indices = @transform_3, window_bounds = array<i64: 2, 1, 16, 16>}, {transform_indices = @transform_4, window_bounds = array<i64: 2, 1, 16, 16>}, {transform_indices = @transform_5, window_bounds = array<i64: 2, 1, 16, 16>}]} {
    %c0 = arith.constant 0 : index
    %c0_0 = arith.constant 0 : index
    %0 = vector.load %arg2[%c0, %c0_0] : memref<16x1xi32, #tpu.memory_space<vmem>>, vector<16x1xi32>
    %c0_1 = arith.constant 0 : index
    %c0_2 = arith.constant 0 : index
    %1 = vector.load %arg3[%c0_1, %c0_2] : memref<1x16xi32, #tpu.memory_space<vmem>>, vector<1x16xi32>
    %cst = arith.constant 0.000000e+00 : f32
    %2 = vector.broadcast %cst : f32 to vector<4x16xf32>
    %c0_3 = arith.constant 0 : index
    %c0_4 = arith.constant 0 : index
    %c0_5 = arith.constant 0 : index
    %c0_6 = arith.constant 0 : index
    %3 = vector.load %arg4[%c0_3, %c0_4, %c0_5, %c0_6] : memref<1x1x4x4xf32, #tpu.memory_space<vmem>>, vector<1x1x4x1xf32>
    %4 = vector.shape_cast %3 : vector<1x1x4x1xf32> to vector<4x1xf32>
    %cst_7 = arith.constant 1.000000e-03 : f32
    %cst_8 = arith.constant 1.000000e+00 : f32
    %5 = vector.broadcast %cst_7 : f32 to vector<4x1xf32>
    %6 = arith.maximumf %5, %4 : vector<4x1xf32>
    %7 = vector.broadcast %cst_8 : f32 to vector<4x1xf32>
    %8 = arith.minimumf %7, %6 : vector<4x1xf32>
    %c0_i32 = arith.constant 0 : i32
    %9 = vector.broadcast %c0_i32 : i32 to vector<1x16xi32>
    %10 = arith.cmpi eq, %1, %9 : vector<1x16xi32>
    %cst_9 = arith.constant 0.000000e+00 : f32
    %11 = vector.shape_cast %10 : vector<1x16xi1> to vector<1x16xi1>
    %12 = vector.broadcast %11 : vector<1x16xi1> to vector<4x16xi1>
    %13 = vector.shape_cast %8 : vector<4x1xf32> to vector<4x1xf32>
    %14 = vector.broadcast %13 : vector<4x1xf32> to vector<4x16xf32>
    %15 = vector.broadcast %cst_9 : f32 to vector<4x16xf32>
    %16 = arith.select %12, %14, %15 : vector<4x16xi1>, vector<4x16xf32>
    %17 = arith.addf %2, %16 : vector<4x16xf32>
    %c0_10 = arith.constant 0 : index
    %c0_11 = arith.constant 0 : index
    %c0_12 = arith.constant 0 : index
    %c1 = arith.constant 1 : index
    %18 = vector.load %arg4[%c0_10, %c0_11, %c0_12, %c1] : memref<1x1x4x4xf32, #tpu.memory_space<vmem>>, vector<1x1x4x1xf32>
    %19 = vector.shape_cast %18 : vector<1x1x4x1xf32> to vector<4x1xf32>
    %cst_13 = arith.constant 1.000000e-03 : f32
    %cst_14 = arith.constant 1.000000e+00 : f32
    %20 = vector.broadcast %cst_13 : f32 to vector<4x1xf32>
    %21 = arith.maximumf %20, %19 : vector<4x1xf32>
    %22 = vector.broadcast %cst_14 : f32 to vector<4x1xf32>
    %23 = arith.minimumf %22, %21 : vector<4x1xf32>
    %c1_i32 = arith.constant 1 : i32
    %24 = vector.broadcast %c1_i32 : i32 to vector<1x16xi32>
    %25 = arith.cmpi eq, %1, %24 : vector<1x16xi32>
    %cst_15 = arith.constant 0.000000e+00 : f32
    %26 = vector.shape_cast %25 : vector<1x16xi1> to vector<1x16xi1>
    %27 = vector.broadcast %26 : vector<1x16xi1> to vector<4x16xi1>
    %28 = vector.shape_cast %23 : vector<4x1xf32> to vector<4x1xf32>
    %29 = vector.broadcast %28 : vector<4x1xf32> to vector<4x16xf32>
    %30 = vector.broadcast %cst_15 : f32 to vector<4x16xf32>
    %31 = arith.select %27, %29, %30 : vector<4x16xi1>, vector<4x16xf32>
    %32 = arith.addf %17, %31 : vector<4x16xf32>
    %c0_16 = arith.constant 0 : index
    %c0_17 = arith.constant 0 : index
    %c0_18 = arith.constant 0 : index
    %c2 = arith.constant 2 : index
    %33 = vector.load %arg4[%c0_16, %c0_17, %c0_18, %c2] : memref<1x1x4x4xf32, #tpu.memory_space<vmem>>, vector<1x1x4x1xf32>
    %34 = vector.shape_cast %33 : vector<1x1x4x1xf32> to vector<4x1xf32>
    %cst_19 = arith.constant 1.000000e-03 : f32
    %cst_20 = arith.constant 1.000000e+00 : f32
    %35 = vector.broadcast %cst_19 : f32 to vector<4x1xf32>
    %36 = arith.maximumf %35, %34 : vector<4x1xf32>
    %37 = vector.broadcast %cst_20 : f32 to vector<4x1xf32>
    %38 = arith.minimumf %37, %36 : vector<4x1xf32>
    %c2_i32 = arith.constant 2 : i32
    %39 = vector.broadcast %c2_i32 : i32 to vector<1x16xi32>
    %40 = arith.cmpi eq, %1, %39 : vector<1x16xi32>
    %cst_21 = arith.constant 0.000000e+00 : f32
    %41 = vector.shape_cast %40 : vector<1x16xi1> to vector<1x16xi1>
    %42 = vector.broadcast %41 : vector<1x16xi1> to vector<4x16xi1>
    %43 = vector.shape_cast %38 : vector<4x1xf32> to vector<4x1xf32>
    %44 = vector.broadcast %43 : vector<4x1xf32> to vector<4x16xf32>
    %45 = vector.broadcast %cst_21 : f32 to vector<4x16xf32>
    %46 = arith.select %42, %44, %45 : vector<4x16xi1>, vector<4x16xf32>
    %47 = arith.addf %32, %46 : vector<4x16xf32>
    %c0_22 = arith.constant 0 : index
    %c0_23 = arith.constant 0 : index
    %c0_24 = arith.constant 0 : index
    %c3 = arith.constant 3 : index
    %48 = vector.load %arg4[%c0_22, %c0_23, %c0_24, %c3] : memref<1x1x4x4xf32, #tpu.memory_space<vmem>>, vector<1x1x4x1xf32>
    %49 = vector.shape_cast %48 : vector<1x1x4x1xf32> to vector<4x1xf32>
    %cst_25 = arith.constant 1.000000e-03 : f32
    %cst_26 = arith.constant 1.000000e+00 : f32
    %50 = vector.broadcast %cst_25 : f32 to vector<4x1xf32>
    %51 = arith.maximumf %50, %49 : vector<4x1xf32>
    %52 = vector.broadcast %cst_26 : f32 to vector<4x1xf32>
    %53 = arith.minimumf %52, %51 : vector<4x1xf32>
    %c3_i32 = arith.constant 3 : i32
    %54 = vector.broadcast %c3_i32 : i32 to vector<1x16xi32>
    %55 = arith.cmpi eq, %1, %54 : vector<1x16xi32>
    %cst_27 = arith.constant 0.000000e+00 : f32
    %56 = vector.shape_cast %55 : vector<1x16xi1> to vector<1x16xi1>
    %57 = vector.broadcast %56 : vector<1x16xi1> to vector<4x16xi1>
    %58 = vector.shape_cast %53 : vector<4x1xf32> to vector<4x1xf32>
    %59 = vector.broadcast %58 : vector<4x1xf32> to vector<4x16xf32>
    %60 = vector.broadcast %cst_27 : f32 to vector<4x16xf32>
    %61 = arith.select %57, %59, %60 : vector<4x16xi1>, vector<4x16xf32>
    %62 = arith.addf %47, %61 : vector<4x16xf32>
    %cst_28 = arith.constant 0.000000e+00 : f32
    %63 = vector.broadcast %cst_28 : f32 to vector<16x16xf32>
    %c0_i32_29 = arith.constant 0 : i32
    %64 = vector.broadcast %c0_i32_29 : i32 to vector<16x1xi32>
    %65 = arith.cmpi eq, %0, %64 : vector<16x1xi32>
    %66 = vector.extract_strided_slice %62 {offsets = [0, 0], sizes = [1, 16], strides = [1, 1]} : vector<4x16xf32> to vector<1x16xf32>
    %cst_30 = arith.constant 0.000000e+00 : f32
    %67 = vector.shape_cast %65 : vector<16x1xi1> to vector<16x1xi1>
    %68 = vector.broadcast %67 : vector<16x1xi1> to vector<16x16xi1>
    %69 = vector.shape_cast %66 : vector<1x16xf32> to vector<1x16xf32>
    %70 = vector.broadcast %69 : vector<1x16xf32> to vector<16x16xf32>
    %71 = vector.broadcast %cst_30 : f32 to vector<16x16xf32>
    %72 = arith.select %68, %70, %71 : vector<16x16xi1>, vector<16x16xf32>
    %73 = arith.addf %63, %72 : vector<16x16xf32>
    %c1_i32_31 = arith.constant 1 : i32
    %74 = vector.broadcast %c1_i32_31 : i32 to vector<16x1xi32>
    %75 = arith.cmpi eq, %0, %74 : vector<16x1xi32>
    %76 = vector.extract_strided_slice %62 {offsets = [1, 0], sizes = [1, 16], strides = [1, 1]} : vector<4x16xf32> to vector<1x16xf32>
    %cst_32 = arith.constant 0.000000e+00 : f32
    %77 = vector.shape_cast %75 : vector<16x1xi1> to vector<16x1xi1>
    %78 = vector.broadcast %77 : vector<16x1xi1> to vector<16x16xi1>
    %79 = vector.shape_cast %76 : vector<1x16xf32> to vector<1x16xf32>
    %80 = vector.broadcast %79 : vector<1x16xf32> to vector<16x16xf32>
    %81 = vector.broadcast %cst_32 : f32 to vector<16x16xf32>
    %82 = arith.select %78, %80, %81 : vector<16x16xi1>, vector<16x16xf32>
    %83 = arith.addf %73, %82 : vector<16x16xf32>
    %c2_i32_33 = arith.constant 2 : i32
    %84 = vector.broadcast %c2_i32_33 : i32 to vector<16x1xi32>
    %85 = arith.cmpi eq, %0, %84 : vector<16x1xi32>
    %86 = vector.extract_strided_slice %62 {offsets = [2, 0], sizes = [1, 16], strides = [1, 1]} : vector<4x16xf32> to vector<1x16xf32>
    %cst_34 = arith.constant 0.000000e+00 : f32
    %87 = vector.shape_cast %85 : vector<16x1xi1> to vector<16x1xi1>
    %88 = vector.broadcast %87 : vector<16x1xi1> to vector<16x16xi1>
    %89 = vector.shape_cast %86 : vector<1x16xf32> to vector<1x16xf32>
    %90 = vector.broadcast %89 : vector<1x16xf32> to vector<16x16xf32>
    %91 = vector.broadcast %cst_34 : f32 to vector<16x16xf32>
    %92 = arith.select %88, %90, %91 : vector<16x16xi1>, vector<16x16xf32>
    %93 = arith.addf %83, %92 : vector<16x16xf32>
    %c3_i32_35 = arith.constant 3 : i32
    %94 = vector.broadcast %c3_i32_35 : i32 to vector<16x1xi32>
    %95 = arith.cmpi eq, %0, %94 : vector<16x1xi32>
    %96 = vector.extract_strided_slice %62 {offsets = [3, 0], sizes = [1, 16], strides = [1, 1]} : vector<4x16xf32> to vector<1x16xf32>
    %cst_36 = arith.constant 0.000000e+00 : f32
    %97 = vector.shape_cast %95 : vector<16x1xi1> to vector<16x1xi1>
    %98 = vector.broadcast %97 : vector<16x1xi1> to vector<16x16xi1>
    %99 = vector.shape_cast %96 : vector<1x16xf32> to vector<1x16xf32>
    %100 = vector.broadcast %99 : vector<1x16xf32> to vector<16x16xf32>
    %101 = vector.broadcast %cst_36 : f32 to vector<16x16xf32>
    %102 = arith.select %98, %100, %101 : vector<16x16xi1>, vector<16x16xf32>
    %103 = arith.addf %93, %102 : vector<16x16xf32>
    %c0_37 = arith.constant 0 : index
    %c0_38 = arith.constant 0 : index
    %c0_39 = arith.constant 0 : index
    %c0_40 = arith.constant 0 : index
    %104 = vector.load %arg5[%c0_37, %c0_38, %c0_39, %c0_40] : memref<2x1x16x16xf32, #tpu.memory_space<vmem>>, vector<2x1x16x16xf32>
    %105 = vector.shape_cast %104 : vector<2x1x16x16xf32> to vector<2x16x16xf32>
    %c0_41 = arith.constant 0 : index
    %c0_42 = arith.constant 0 : index
    %c0_43 = arith.constant 0 : index
    %c0_44 = arith.constant 0 : index
    %106 = vector.load %arg6[%c0_41, %c0_42, %c0_43, %c0_44] : memref<2x1x16x16xf32, #tpu.memory_space<vmem>>, vector<2x1x16x16xf32>
    %107 = vector.shape_cast %106 : vector<2x1x16x16xf32> to vector<2x16x16xf32>
    %108 = vector.shape_cast %103 : vector<16x16xf32> to vector<1x16x16xf32>
    %109 = vector.broadcast %108 : vector<1x16x16xf32> to vector<2x16x16xf32>
    %110 = arith.mulf %109, %107 : vector<2x16x16xf32>
    %111 = arith.addf %105, %110 : vector<2x16x16xf32>
    %c0_45 = arith.constant 0 : index
    %c0_46 = arith.constant 0 : index
    %c0_47 = arith.constant 0 : index
    %c0_48 = arith.constant 0 : index
    %112 = vector.load %arg7[%c0_45, %c0_46, %c0_47, %c0_48] : memref<2x1x16x16xf32, #tpu.memory_space<vmem>>, vector<2x1x16x16xf32>
    %113 = vector.shape_cast %112 : vector<2x1x16x16xf32> to vector<2x16x16xf32>
    %114 = vector.shape_cast %111 : vector<2x16x16xf32> to vector<2x1x16x16xf32>
    tpu.vector_store %arg7[%c0_45, %c0_46, %c0_47, %c0_48], %114 {strides = array<i32>} : memref<2x1x16x16xf32, #tpu.memory_space<vmem>>, vector<2x1x16x16xf32>,
    return
  }
  func.func @transform_0(%arg0: i32, %arg1: i32) -> (i32, i32) {
    %c0_i32 = arith.constant 0 : i32
    %c0_i32_0 = arith.constant 0 : i32
    %c0_i32_1 = arith.constant 0 : i32
    return %c0_i32, %c0_i32_0 : i32, i32
  }
  func.func @transform_1(%arg0: i32, %arg1: i32) -> (i32, i32) {
    %c0_i32 = arith.constant 0 : i32
    %c0_i32_0 = arith.constant 0 : i32
    %c0_i32_1 = arith.constant 0 : i32
    return %c0_i32, %c0_i32_0 : i32, i32
  }
  func.func @transform_2(%arg0: i32, %arg1: i32) -> (i32, i32, i32, i32) {
    %c0_i32 = arith.constant 0 : i32
    %c0_i32_0 = arith.constant 0 : i32
    %c0_i32_1 = arith.constant 0 : i32
    %c0_i32_2 = arith.constant 0 : i32
    return %c0_i32, %arg0, %c0_i32_0, %c0_i32_1 : i32, i32, i32, i32
  }
  func.func @transform_3(%arg0: i32, %arg1: i32) -> (i32, i32, i32, i32) {
    %c0_i32 = arith.constant 0 : i32
    %c0_i32_0 = arith.constant 0 : i32
    %c0_i32_1 = arith.constant 0 : i32
    return %arg1, %arg0, %c0_i32, %c0_i32_0 : i32, i32, i32, i32
  }
  func.func @transform_4(%arg0: i32, %arg1: i32) -> (i32, i32, i32, i32) {
    %c0_i32 = arith.constant 0 : i32
    %c0_i32_0 = arith.constant 0 : i32
    %c0_i32_1 = arith.constant 0 : i32
    return %arg1, %arg0, %c0_i32, %c0_i32_0 : i32, i32, i32, i32
  }
  func.func @transform_5(%arg0: i32, %arg1: i32) -> (i32, i32, i32, i32) {
    %c0_i32 = arith.constant 0 : i32
    %c0_i32_0 = arith.constant 0 : i32
    %c0_i32_1 = arith.constant 0 : i32
    return %arg1, %arg0, %c0_i32, %c0_i32_0 : i32, i32, i32, i32
  }
}

</mosaic_0001>

<bundles_post_ra>
// kernel: tpu_custom_call.1
= control target key start
LH: loop header
LB: loop body
LE: loop exit
PB: predicated region body
PF: predicated region fallthrough
CT: control target
= control target key end

     0   :  { %s1173_s0 = inlined_call_operand.vmem [shape: s32[16,1], index: 0, kind: input, shape index: {}]   ;;  %s1174_s1 = inlined_call_operand.vmem [shape: s32[1,16], index: 1, kind: input, shape index: {}]   ;;  %s1175_s2 = inlined_call_operand.vmem [shape: f32[1,4,4,4], index: 2, kind: input, shape index: {}]   ;;  %s1176_s3 = inlined_call_operand.hbm [shape: f32[2,4,16,16], index: 3, kind: input, shape index: {}]   ;;  %s1177_s4 = inlined_call_operand.hbm [shape: f32[2,4,16,16], index: 4, kind: input, shape index: {}]   ;;  %s1178_s5 = inlined_call_operand.hbm [shape: f32[2,4,16,16], index: 5, kind: output, shape index: {}]  }
   0x1   :  { %1181 = sst [smem:[#allocation21_spill]] %s1176_s3 }
   0x2   :  { %10 = vsyncpa [#allocation3], 0 }
   0x3   :  { %12 = vsyncpa [#allocation3 + $0x1], 0 }
   0x4   :  { %13 = vsyncpa [#allocation6], 0 }
   0x5   :  { %15 = vsyncpa [#allocation6 + $0x1], 0 }
   0x6   :  { %16 = vsyncpa [#allocation4], 0 }
   0x7   :  { %18 = vsyncpa [#allocation4 + $0x1], 0  ;;  %s957_s18 = smov 0   ;;  %s959_s19 = smov 0  }
   0x8   :  { %s961_s20 = smov 0   ;;  %s963_s21 = smov 0  }
   0x9   :  { %s965_s22 = smov 0   ;;  %s967_s23 = smov 0  }
   0xa LB: > { %1182 = sst [smem:[#allocation19_spill]] %s898_s22  ;;  %s708_s24 = sadd.s32 4294967295, %s902_s23   ;;  %s902_s23 = sphi %s967_s23, %s24_s23   ;;  %s898_s22 = sphi %s965_s22, %s1190_s22   ;;  %s894_s21 = sphi %s963_s21, %s1189_s21   ;;  %s890_s20 = sphi %s961_s20, %s1193_s20   ;;  %s886_s19 = sphi %s959_s19, %s1192_s19   ;;  %s882_s18 = sphi %s957_s18, %s1191_s18  }
   0xb   : > { %s709_s25 = sadd.s32 4294967294, %s902_s23   ;;  %s36_s26 = sadd.s32 1, %s898_s22 }
   0xc   : > { %s113_s27 = sadd.s32 1, %s890_s20  ;;  %p38_p0 = scmp.ge.s32.totalorder %s36_s26, 4 }
   0xd   : > { %p120_p1 = scmp.ne.s32.totalorder %s890_s20, %s886_s19  ;;  %p121_p2 = scmp.eq.s32.totalorder %s902_s23, 0 }
   0xe   : > { %p126_p3 = scmp.ne.s32.totalorder %s886_s19, %s882_s18  ;;  %s1195_s26 = smov (%p38_p0, %s36_s26), 0 }
   0xf   : > { %1183 = sst [smem:[#allocation20_spill]] %s1195_s26  ;;  %p998_p4 = por %p121_p2, %p120_p1 }
  0x10   : > { %p127_p5 = scmp.eq.s32.totalorder %s708_s24, 0  ;;  %s109_s29 = ssub.s32 %s898_s22, %s1195_s26 }
  0x11   : > { %p180_p6 = scmp.eq.s32.totalorder %s708_s24, 3  ;;  %p111_p7 = scmp.eq.s32.totalorder %s109_s29, 0 }
  0x12   : > { %p1004_p8 = por %p127_p5, %p126_p3  ;;  %p186_p10 = scmp.eq.s32.totalorder %s709_s25, 3 }
  0x13   : > { %p1008_p9 = por %p180_p6, %p120_p1  ;;  %p711_p12 = scmp.ge.s32.totalorder %s902_s23, 4 }
  0x14   : > { %s1013_s7 = scalar_select %p111_p7, %s890_s20, %s113_s27  }
  0x15   : > { %p1015_p11 = por %p186_p10, %p126_p3  ;;  %208 = sbr.rel (%p711_p12) target bundleno = 54 (0x36), region = 24 }
  0x1c   : > { %s1021_s9 = sand.u32 1, %s890_s20   ;;  %s732_s10 = sshll.u32 %s898_s22, 8 }
  0x1d   : > { %s712_s11 = sshll.u32 %s1021_s9, 5  ;;  %s1188_s3 = sld [smem:[#allocation21_spill]] }
  0x1e   : > { %s735_s15 = scalar_select %p998_p4, [#allocation0], [#allocation14] }
  0x1f   : > { %s223_s16 = scalar_lea.vmem [#allocation2], %s712_s11  ;;  %s904_s25 = smov 1024  }
  0x20   : > { %s245_s17 = sshll.u32 %s223_s16, 4  ;;  %s237_s24 = sld [smem:[%s735_s15]]   ;;  %s246_s17 = int_to_ptr.vmem [resolvable:$true] %s245_s17 }
  0x21   : > { %736 = sst [smem:[#allocation9]] (%p998_p4), %s904_s25  ;;  %s905_s27 = smov 256  }
  0x22   : > { %737 = sst [smem:[#allocation9 + $0x1]] (%p998_p4), %s905_s27  ;;  %s906_s29 = smov 2  }
  0x23   : > { %s232_s14 = scalar_lea.hbm %s1188_s3, %s732_s10  ;;  %738 = sst [smem:[#allocation9 + $0x2]] (%p998_p4), %s906_s29 }
  0x24   : > { %s907_s12 = smov 128   ;;  %s908_s16 = smov 8  }
  0x25   : > { %739 = sst [smem:[#allocation9 + $0x3]] (%p998_p4), %s907_s12  ;;  %s220_s3 = scalar_lea.sflag [#allocation3], %s1021_s9 }
  0x26   : > { %740 = sst [smem:[#allocation9 + $0x4]] (%p998_p4), %s907_s12  ;;  %s715_s13 = sshll.u32 %s237_s24, 26 }
  0x27   : > { %741 = sst [smem:[#allocation9 + $0x5]] (%p998_p4), %s908_s16  ;;  %s716_s15 = sadd.s32 134217728, %s715_s13 }
  0x28   : > { %s909_s26 = smov [#allocation8]  }
  0x29   : > { %742 = dma.general (%p998_p4), %s232_s14, 512, %s246_s17, %s220_s3, %s909_s26, [#allocation9], %s716_s15, 0  }
  0x2a   : > { %s281_s27 = scalar_lea.hbm %s1177_s4, %s732_s10  ;;  %s272_s29 = scalar_lea.vmem [#allocation5], %s712_s11 }
  0x2b   : > { %s743_s24 = scalar_select %p998_p4, [#allocation0], [#allocation15] }
  0x2c   : > { %s294_s12 = sshll.u32 %s272_s29, 4  ;;  %s910_s16 = smov 1024   ;;  %s295_s12 = int_to_ptr.vmem [resolvable:$true] %s294_s12 }
  0x2d   : > { %s286_s13 = sld [smem:[%s743_s24]]   ;;  %s911_s3 = smov 256  }
  0x2e   : > { %744 = sst [smem:[#allocation11]] (%p998_p4), %s910_s16  ;;  %s912_s22 = smov 2  }
  0x2f   : > { %745 = sst [smem:[#allocation11 + $0x1]] (%p998_p4), %s911_s3  ;;  %s913_s26 = smov 128  }
  0x30   : > { %746 = sst [smem:[#allocation11 + $0x2]] (%p998_p4), %s912_s22  ;;  %s914_s11 = smov 8  }
  0x31   : > { %747 = sst [smem:[#allocation11 + $0x3]] (%p998_p4), %s913_s26  ;;  %s269_s17 = scalar_lea.sflag [#allocation6], %s1021_s9 }
  0x32   : > { %748 = sst [smem:[#allocation11 + $0x4]] (%p998_p4), %s913_s26  ;;  %s915_s15 = smov [#allocation10]  }
  0x33   : > { %s720_s10 = sshll.u32 %s286_s13, 26  ;;  %749 = sst [smem:[#allocation11 + $0x5]] (%p998_p4), %s914_s11 }
  0x34   : > { %s721_s14 = sadd.s32 134217728, %s720_s10 }
  0x35   : > { %750 = dma.general (%p998_p4), %s281_s27, 512, %s295_s12, %s269_s17, %s915_s15, [#allocation11], %s721_s14, 0  }
  0x36 PF: > { %p722_p13 = scmp.ge.s32.totalorder %s902_s23, 1  ;;  %p315_p0 = scmp.lt.s32.totalorder %s902_s23, 5 }
  0x38   : > { %p316_p1 = pnand %p722_p13, %p315_p0 }
  0x39   : > { %s1068_s25 = sand.u32 (!%p316_p1), 1, %s886_s19  }
  0x3a   : > { %319 = sbr.rel (%p316_p1) target bundleno = 244 (0xf4), region = 40  ;;  %s1071_s24 = sshll.u32 (!%p316_p1), %s1068_s25, 5 }
  0x3b   : > { %s322_s9 = scalar_lea.sflag (!%p316_p1), [#allocation3], %s1068_s25  ;;  %s1075_s29 = scalar_lea.vmem (!%p316_p1), [#allocation2], %s1071_s24 }
  0x41   : > { %869 = dma.done.wait (%p1004_p8), %s322_s9, 512  }
  0x42   : > { %871 = vsyncadd (%p1004_p8), %s322_s9, 4294966784  ;;  %s331_s28 = scalar_lea.sflag [#allocation6], %s1068_s25  ;;  %s1083_s27 = scalar_lea.vmem [#allocation5], %s1071_s24 }
  0x43   : > { %873 = dma.done.wait (%p1004_p8), %s331_s28, 512  }
  0x44   : > { %875 = vsyncadd (%p1004_p8), %s331_s28, 4294966784  ;;  %p370_p2 = scmp.lt.s32.totalorder %s894_s21, 3  ;;  %v916_v0 = vmov 0   ;;  %v377_v1 = vld [vmem:[%s1173_s0] sm:$0xff]  ;;  %v378_v7 = vld [vmem:[%s1173_s0 + $0x8] sm:$0xff]  ;;  %v917_v8 = vmov 1   ;;  %v385_v17 = vlaneseq }
  0x45   : > { %837 = vset.pattern.permute.xlu1 %v916_v0  ;;  %838 = vset.pattern.permute.xlu0 %v916_v0  ;;  %vm436_vm0 = vcmp.eq.s32.totalorder %v377_v1, 0  ;;  %vm456_vm1 = vcmp.eq.s32.totalorder %v377_v1, 1  ;;  %vm437_vm2 = vcmp.eq.s32.totalorder %v378_v7, 0  ;;  %v918_v9 = vmov 2   ;;  %v379_v18 = vld [vmem:[%s1174_s1] sm:$0x1] }
  0x46   : > { %s371_s12 = scalar_select %p370_p2, %s894_s21, 3  ;;  %v438_v4 = vsel %vm436_vm0, 1, %v916_v0  ;;  %v458_v6 = vsel %vm456_vm1, 1, %v916_v0  ;;  %v439_v10 = vsel %vm437_vm2, 1, %v916_v0  ;;  %vm476_vm3 = vcmp.eq.s32.totalorder %v377_v1, 2  ;;  %v520_v61 = vld [vmem:[%s1083_s27] sm:$0xff] }
  0x47   : > { %441 = vperm.xlu1 %837, %v438_v4   ;;  %v919_v11 = vmov 3   ;;  %v478_v12 = vsel %vm476_vm3, 1, %v916_v0  ;;  %vm457_vm4 = vcmp.eq.s32.totalorder %v378_v7, 1  ;;  %vm496_vm5 = vcmp.eq.s32.totalorder %v377_v1, 3  ;;  %v522_v62 = vld [vmem:[%s1083_s27 + $0x10] sm:$0xff]  ;;  %s369_s15 = scalar_lea.vmem [#allocation7], %s1071_s24 }
  0x48   : > { %s726_s13 = sshll.u32 %s371_s12, 2  ;;  %v459_v13 = vsel %vm457_vm4, 1, %v916_v0  ;;  %v498_v14 = vsel %vm496_vm5, 1, %v916_v0  ;;  %vm477_vm6 = vcmp.eq.s32.totalorder %v378_v7, 2  ;;  %vm497_vm7 = vcmp.eq.s32.totalorder %v378_v7, 3  ;;  %v518_v4 = vld [vmem:[%s1075_s29 + $0x10] sm:$0xff] }
  0x49   : > { %s373_s22 = scalar_lea.vmem %s1175_s2, %s726_s13  ;;  %v479_v15 = vsel %vm477_vm6, 1, %v916_v0  ;;  %v499_v16 = vsel %vm497_vm7, 1, %v916_v0  ;;  %v386_v19 = vshrl.u32 %v385_v17, 7  ;;  %vm383_vm8 = vcmp.eq.s32.totalorder %v379_v18, 0  ;;  %s538_s9 = scalar_lea.sflag [#allocation4], %s1068_s25 }
  0x4a   : > { %v380_v2 = vld [vmem:[%s373_s22] sm:$0xf]  ;;  %vm397_vm9 = vcmp.eq.s32.totalorder %v379_v18, 1  ;;  %v384_v21 = vsel %vm383_vm8, 1, %v916_v0  ;;  %vm410_vm10 = vcmp.eq.s32.totalorder %v379_v18, 2  ;;  %vm423_vm11 = vcmp.eq.s32.totalorder %v379_v18, 3 }
  0x4b   : > { %v381_v3 = vmax.f32 %v380_v2, 0.001  ;;  %461 = vperm.xlu1 %837, %v458_v6   ;;  %v387_v20 = vsub.s32 0, %v386_v19  ;;  %v398_v22 = vsel %vm397_vm9, 1, %v916_v0  ;;  %v411_v26 = vsel %vm410_vm10, 1, %v916_v0 }
  0x4c   : > { %v424_v30 = vsel %vm423_vm11, 1, %v916_v0  ;;  %v470_v41 = vsub.s32 1, %v386_v19  ;;  %v490_v42 = vsub.s32 2, %v386_v19  ;;  %v510_v49 = vsub.s32 3, %v386_v19 }
  0x4d   : > { %v382_v5 = vmin.f32 %v381_v3, 1.0  ;;  %v388_v24 = vrot.slane %v384_v21, %v387_v20  ;;  %v402_v25 = vrot.slane %v398_v22, %v387_v20  ;;  %v415_v29 = vrot.slane %v411_v26, %v387_v20  ;;  %v516_v3 = vld [vmem:[%s1075_s29] sm:$0xff] }
  0x4e   : > { %v428_v34 = vrot.slane %v424_v30, %v387_v20  ;;  %vm532_vm7 = vcmask 130048  }
  0x4f   : > { %392 = vperm.xlu0 %838, %v382_v5   ;;  %841 = vset.pattern.permute.xlu1 %v918_v9  ;;  %vm389_vm12 = vcmp.eq.s32.totalorder %v388_v24, 1  ;;  %vm403_vm13 = vcmp.eq.s32.totalorder %v402_v25, 1  ;;  %vm416_vm14 = vcmp.eq.s32.totalorder %v415_v29, 1 }
  0x50   : > { %418 = vperm.xlu1 %841, %v382_v5   ;;  %vm429_vm15 = vcmp.eq.s32.totalorder %v428_v34, 1 }
  0x53   : > { %839 = vset.pattern.permute.xlu0 %v917_v8 }
  0x54   : > { %405 = vperm.xlu0 %839, %v382_v5   ;;  %842 = vset.pattern.permute.xlu1 %v919_v11  ;;  %v521_v11 = vld [vmem:[%s1083_s27 + $0x8] sm:$0xff] }
  0x55   : > { %431 = vperm.xlu1 %842, %v382_v5  }
  0x58   : > { %840 = vset.pattern.permute.xlu0 %v916_v0 }
  0x59   : > { %444 = vperm.xlu0 %840, %v439_v10   ;;  %843 = vset.pattern.permute.xlu1 %v916_v0 }
  0x5a   : > { %464 = vperm.xlu1 %843, %v459_v13  }
  0x5d   : > { %481 = vperm.xlu0 %840, %v478_v12   ;;  %v523_v12 = vld [vmem:[%s1083_s27 + $0x18] sm:$0xff] }
  0x5e   : > { %484 = vperm.xlu1 %843, %v479_v15   ;;  %v517_v15 = vld [vmem:[%s1075_s29 + $0x8] sm:$0xff] }
  0x61   : > { %501 = vperm.xlu0 %840, %v498_v14  }
  0x62   : > { %504 = vperm.xlu1 %843, %v499_v16   ;;  %v519_v16 = vld [vmem:[%s1075_s29 + $0x18] sm:$0xff] }
  0xc6   : > { %v442_v23 = vpop.permute.xlu1 %441 }
  0xc7   : > { %vm446_vm0 = vcmp.eq.s32.totalorder %v442_v23, 1 }
  0xca   : > { %v462_v28 = vpop.permute.xlu1 %461 }
  0xcb   : > { %vm466_vm1 = vcmp.eq.s32.totalorder %v462_v28, 1 }
  0xce   : > { %v393_v27 = vpop.permute.xlu0 %392 }
  0xcf   : > { %v395_v31 = vsel %vm389_vm12, %v393_v27, 0.0  ;;  %v419_v35 = vpop.permute.xlu1 %418 }
  0xd0   : > { %v421_v37 = vsel %vm416_vm14, %v419_v35, 0.0 }
  0xd3   : > { %v406_v32 = vpop.permute.xlu0 %405 }
  0xd4   : > { %v408_v33 = vsel %vm403_vm13, %v406_v32, 0.0  ;;  %v432_v40 = vpop.permute.xlu1 %431 }
  0xd5   : > { %v409_v36 = vadd.f32 %v408_v33, %v395_v31  ;;  %v434_v43 = vsel %vm429_vm15, %v432_v40, 0.0 }
  0xd7   : > { %v422_v39 = vadd.f32 %v421_v37, %v409_v36 }
  0xd8   : > { %v445_v38 = vpop.permute.xlu0 %444 }
  0xd9   : > { %v435_v44 = vadd.f32 %v434_v43, %v422_v39  ;;  %v465_v50 = vpop.permute.xlu1 %464  ;;  %vm447_vm3 = vcmp.eq.s32.totalorder %v445_v38, 1 }
  0xda   : > { %vm467_vm4 = vcmp.eq.s32.totalorder %v465_v50, 1 }
  0xdb   : > { %v451_v46 = vrot.slane %v435_v44, %v387_v20  ;;  %v471_v47 = vrot.slane %v435_v44, %v470_v41  ;;  %v491_v48 = vrot.slane %v435_v44, %v490_v42  ;;  %v511_v56 = vrot.slane %v435_v44, %v510_v49 }
  0xdc   : > { %v482_v45 = vpop.permute.xlu0 %481 }
  0xdd   : > { %vm486_vm2 = vcmp.eq.s32.totalorder %v482_v45, 1  ;;  %v452_v51 = vsel %vm446_vm0, %v451_v46, 0.0  ;;  %v472_v52 = vsel %vm466_vm1, %v471_v47, 0.0  ;;  %v453_v58 = vsel %vm447_vm3, %v451_v46, 0.0  ;;  %v485_v60 = vpop.permute.xlu1 %484 }
  0xde   : > { %v474_v54 = vadd.f32 %v472_v52, %v452_v51  ;;  %v492_v55 = vsel %vm486_vm2, %v491_v48, 0.0  ;;  %v473_v59 = vsel %vm467_vm4, %v471_v47, 0.0  ;;  %vm487_vm6 = vcmp.eq.s32.totalorder %v485_v60, 1 }
  0xdf   : > { %v493_v1 = vsel %vm487_vm6, %v491_v48, 0.0  ;;  %v475_v2 = vadd.f32 %v473_v59, %v453_v58 }
  0xe0   : > { %v502_v53 = vpop.permute.xlu0 %501  ;;  %v494_v57 = vadd.f32 %v492_v55, %v474_v54 }
  0xe1   : > { %vm506_vm5 = vcmp.eq.s32.totalorder %v502_v53, 1  ;;  %v505_v7 = vpop.permute.xlu1 %504  ;;  %v495_v8 = vadd.f32 %v493_v1, %v475_v2 }
  0xe2   : > { %v512_v63 = vsel %vm506_vm5, %v511_v56, 0.0  ;;  %vm507_vm8 = vcmp.eq.s32.totalorder %v505_v7, 1 }
  0xe3   : > { %v514_v0 = vadd.f32 %v512_v63, %v494_v57  ;;  %v513_v13 = vsel %vm507_vm8, %v511_v56, 0.0 }
  0xe4   : > { %v515_v14 = vadd.f32 %v513_v13, %v495_v8 }
  0xe5   : > { %v524_v5 = vmul.f32 %v520_v61, %v514_v0  ;;  %v526_v6 = vmul.f32 %v522_v62, %v514_v0 }
  0xe6   : > { %v525_v17 = vmul.f32 %v521_v11, %v515_v14  ;;  %v527_v18 = vmul.f32 %v523_v12, %v515_v14 }
  0xe7   : > { %v528_v9 = vadd.f32 %v524_v5, %v516_v3  ;;  %v530_v10 = vadd.f32 %v526_v6, %v518_v4 }
  0xe8   : > { %v529_v19 = vadd.f32 %v525_v17, %v517_v15  ;;  %v531_v20 = vadd.f32 %v527_v18, %v519_v16 }
  0xe9   : > { %533 = vst.msk [vmem:[%s369_s15] sm:$0xff] %vm532_vm7, %v528_v9  ;;  %535 = vst.msk [vmem:[%s369_s15 + $0x10] sm:$0xff] %vm532_vm7, %v530_v10 }
  0xea   : > { %534 = vst.msk [vmem:[%s369_s15 + $0x8] sm:$0xff] %vm532_vm7, %v529_v19  ;;  %536 = vst.msk [vmem:[%s369_s15 + $0x18] sm:$0xff] %vm532_vm7, %v531_v20 }
  0xeb   : > { %s734_s24 = sshll.u32 %s894_s21, 8  ;;  %s570_s28 = sshll.u32 %s369_s15, 4  ;;  %s571_s28 = int_to_ptr.vmem [resolvable:$true] %s570_s28 }
  0xec   : > { %s553_s12 = scalar_lea.hbm %s1178_s5, %s734_s24  ;;  %s920_s13 = smov 256  }
  0xed   : > { %753 = sst [smem:[#allocation13]] (%p1008_p9), %s920_s13  ;;  %s921_s16 = smov 1024  }
  0xee   : > { %754 = sst [smem:[#allocation13 + $0x1]] (%p1008_p9), %s921_s16  ;;  %s922_s25 = smov 2  }
  0xef   : > { %755 = sst [smem:[#allocation13 + $0x2]] (%p1008_p9), %s922_s25  ;;  %s923_s3 = smov 128  }
  0xf0   : > { %756 = sst [smem:[#allocation13 + $0x3]] (%p1008_p9), %s923_s3  ;;  %s924_s21 = smov 8  }
  0xf1   : > { %757 = sst [smem:[#allocation13 + $0x4]] (%p1008_p9), %s923_s3  ;;  %s925_s22 = smov [#allocation12]  }
  0xf2   : > { %758 = sst [smem:[#allocation13 + $0x5]] (%p1008_p9), %s924_s21  ;;  %s926_s26 = smov 0  }
  0xf3   : > { %759 = dma.general (%p1008_p9), %s571_s28, 512, %s553_s12, %s538_s9, %s925_s22, [#allocation13], %s926_s26, 0  }
  0xf4 PF: > { %p765_p3 = scmp.ge.s32.totalorder %s902_s23, 2  ;;  %s598_s10 = sand.u32 1, %s882_s18  }
  0xf5   : > { %s599_s30 = scalar_lea.sflag [#allocation4], %s598_s10 }
  0xf6   : > { %p762_p4 = pnand %p765_p3, %p1015_p11 }
  0xf8   : > { %877 = dma.done.wait (!%p762_p4), %s599_s30, 512  }
  0xf9   : > { %879 = vsyncadd (!%p762_p4), %s599_s30, 4294966784  ;;  %s24_s23 = sadd.s32 1, %s902_s23   ;;  %s1189_s21 = sld [smem:[#allocation19_spill]] }
  0xfa   : > { %p21_p5 = scmp.ge.s32.totalorder %s24_s23, 6   ;;  %s1190_s22 = sld [smem:[#allocation20_spill]] }
  0xfb   : > { %s1191_s18 = smov %s886_s19  ;;  %s1192_s19 = smov %s890_s20 }
  0xfc   : > { %s1193_s20 = smov %s1013_s7  ;;  %23 = sbr.rel (!%p21_p5) target bundleno = 10 (0xa), region = 116 }
 0x103   :  { %604 = vsyncpa [#allocation3], 1 }
 0x104   :  { %606 = vsyncpa [#allocation3 + $0x1], 1 }
 0x105   :  { %607 = vsyncpa [#allocation6], 1 }
 0x106   :  { %609 = vsyncpa [#allocation6 + $0x1], 1 }
 0x107   :  { %610 = vsyncpa [#allocation4], 1 }
 0x108   :  { %612 = vsyncpa [#allocation4 + $0x1], 1 }

</bundles_post_ra>
